<compile_context>
chip_gen: v7x
topology: tpu7x:2x2x1
jax: 0.10.0
libtpu: 0.0.40
codegen_flags: <defaults>
</compile_context>

<pallas_src>
import functools

import numpy as np
import jax
import jax.numpy as jnp
from jax.experimental import pallas as pl
from jax.experimental.pallas import tpu as pltpu


# -----------------------------------------------------------------------------
# In-kernel helpers
# -----------------------------------------------------------------------------
def _layernorm(x, gamma, beta, eps=1e-5):
    """LayerNorm over the last dim (eps = 1e-5, as nn.LayerNorm)."""
    mu = jnp.mean(x, axis=-1, keepdims=True)
    var = jnp.mean(jnp.square(x - mu), axis=-1, keepdims=True)
    return (x - mu) * jax.lax.rsqrt(var + eps) * gamma + beta


# -----------------------------------------------------------------------------
# Fused encoder layer kernel:  FNet mix -> add&LN -> FFN(relu) -> add&LN
# -----------------------------------------------------------------------------
def _encoder_layer_kernel(x_ref, cl_ref, sl_ref, cd_ref, sd_ref,
                          w1_ref, b1_ref, w2_ref, b2_ref,
                          g1_ref, be1_ref, g2_ref, be2_ref, o_ref):
    # TODO(synk): F_Attention() source not provided; parameter-free FNet-style
    # Fourier mixing inferred from its parameter-free single-input signature.
    x = x_ref[0].astype(jnp.float32)                                  # (L, D)
    # Re(F_L x F_D) = C_L x C_D - S_L x S_D
    a = jnp.dot(jnp.dot(cl_ref[...], x, preferred_element_type=jnp.float32),
                cd_ref[...], preferred_element_type=jnp.float32)
    b = jnp.dot(jnp.dot(sl_ref[...], x, preferred_element_type=jnp.float32),
                sd_ref[...], preferred_element_type=jnp.float32)
    z = _layernorm(a - b + x, g1_ref[...], be1_ref[...])
    h = jnp.dot(z, w1_ref[...], preferred_element_type=jnp.float32) + b1_ref[...]
    h = jnp.maximum(h, 0.0)
    h = jnp.dot(h, w2_ref[...], preferred_element_type=jnp.float32) + b2_ref[...]
    o_ref[0] = _layernorm(h + z, g2_ref[...], be2_ref[...]).astype(o_ref.dtype)


# -----------------------------------------------------------------------------
# Fused decoder layer kernel:
#   masked self-attn (shared Wq/Wk) -> add&LN -> relu-kernel cross-attn
#   -> add&LN -> FFN(relu) -> add&LN
#   (+ optional K/V context projection on layer 0, optional attn-map output)
# -----------------------------------------------------------------------------
def _decoder_layer_kernel(*refs, project_context, write_attn, H, dk, scale):
    it = iter(refs)
    y_ref = next(it)
    if project_context:
        enc_ref = next(it)
    else:
        kctx_ref = next(it)
        vctx_ref = next(it)
    s_wq = next(it); s_bq = next(it)
    s_wv = next(it); s_bv = next(it)
    s_wo = next(it); s_bo = next(it)
    c_wq = next(it); c_bq = next(it)
    if project_context:
        c_wk = next(it); c_bk = next(it)
        c_wv = next(it); c_bv = next(it)
    c_wo = next(it); c_bo = next(it)
    w1 = next(it); b1 = next(it)
    w2 = next(it); b2 = next(it)
    g1 = next(it); be1 = next(it)
    g2 = next(it); be2 = next(it)
    g3 = next(it); be3 = next(it)
    # outputs
    y_out = next(it)
    if project_context:
        kctx_out = next(it)
        vctx_out = next(it)
    if write_attn:
        attn_out = next(it)
    # scratch (VMEM) buffers for merged-head attention outputs
    sa_buf = next(it)
    ca_buf = next(it)

    y = y_ref[0].astype(jnp.float32)                                  # (Ly, D)
    Ly = y.shape[0]

    # ---------------- masked self attention (Wk == Wq, computed once) -------
    q = jnp.dot(y, s_wq[...], preferred_element_type=jnp.float32) + s_bq[...]
    v = jnp.dot(y, s_wv[...], preferred_element_type=jnp.float32) + s_bv[...]
    row = jax.lax.broadcasted_iota(jnp.int32, (Ly, Ly), 0)
    col = jax.lax.broadcasted_iota(jnp.int32, (Ly, Ly), 1)
    causal = col <= row                                               # tril
    for h in range(H):
        hs = slice(h * dk, (h + 1) * dk)
        qh = q[:, hs]                                                 # (Ly, dk)
        vh = v[:, hs]
        s = jnp.dot(qh, qh.T, preferred_element_type=jnp.float32) * scale
        s = jnp.where(causal, s, -1e30)
        s = s - jnp.max(s, axis=-1, keepdims=True)
        e = jnp.exp(s)
        p = e * pl.reciprocal(jnp.sum(e, axis=-1, keepdims=True), approx=True)
        sa_buf[:, hs] = jnp.dot(p, vh, preferred_element_type=jnp.float32)
    sa = jnp.dot(sa_buf[...], s_wo[...],
                 preferred_element_type=jnp.float32) + s_bo[...]
    z = _layernorm(sa + y, g1[...], be1[...])

    # ---------------- cross (relu-kernel linear) attention ------------------
    # TODO(synk): P_Attention source not provided; relu feature-map linear
    # attention inferred from kernel_type='relu' and the (k, v) context reuse.
    if project_context:
        enc = enc_ref[0].astype(jnp.float32)                          # (Lx, D)
        kctx = jnp.dot(enc, c_wk[...], preferred_element_type=jnp.float32) + c_bk[...]
        vctx = jnp.dot(enc, c_wv[...], preferred_element_type=jnp.float32) + c_bv[...]
        kctx_out[0] = kctx.astype(kctx_out.dtype)
        vctx_out[0] = vctx.astype(vctx_out.dtype)
    else:
        kctx = kctx_ref[0].astype(jnp.float32)                        # (Lx, H*dk)
        vctx = vctx_ref[0].astype(jnp.float32)

    qc = jnp.dot(z, c_wq[...], preferred_element_type=jnp.float32) + c_bq[...]
    for h in range(H):
        hs = slice(h * dk, (h + 1) * dk)
        qh = jnp.maximum(qc[:, hs], 0.0)
        kh = jnp.maximum(kctx[:, hs], 0.0)
        vh = vctx[:, hs]
        scores = jnp.dot(qh, kh.T, preferred_element_type=jnp.float32)  # (Ly, Lx)
        attn_h = scores / (jnp.sum(scores, axis=-1, keepdims=True) + 1e-6)
        ca_buf[:, hs] = jnp.dot(attn_h, vh, preferred_element_type=jnp.float32)
        if write_attn:
            attn_out[0, h] = attn_h.astype(attn_out.dtype)
    ca = jnp.dot(ca_buf[...], c_wo[...],
                 preferred_element_type=jnp.float32) + c_bo[...]
    zz = _layernorm(ca + z, g2[...], be2[...])

    # ---------------- feed-forward ------------------------------------------
    hdd = jnp.dot(zz, w1[...], preferred_element_type=jnp.float32) + b1[...]
    hdd = jnp.maximum(hdd, 0.0)
    hdd = jnp.dot(hdd, w2[...], preferred_element_type=jnp.float32) + b2[...]
    y_out[0] = _layernorm(hdd + zz, g3[...], be3[...]).astype(y_out.dtype)


# -----------------------------------------------------------------------------
# Tied output projection:  logits = (y @ embedding^T) * 1/sqrt(dmodel)
# (contraction done in-kernel; no transposed embedding copy in HBM)
# -----------------------------------------------------------------------------
def _logits_kernel(y_ref, emb_ref, o_ref, *, scale):
    y = y_ref[0].astype(jnp.float32)                                  # (Ly, D)
    e = emb_ref[...].astype(jnp.float32)                              # (V,  D)
    logits = jax.lax.dot_general(y, e, (((1,), (1,)), ((), ())),
                                 preferred_element_type=jnp.float32)
    o_ref[0] = (logits * scale).astype(o_ref.dtype)
    # TODO(synk): for large vocab, tile the vocab axis (lane-dense 128/256
    # multiples) instead of taking the whole embedding as one block.


# -----------------------------------------------------------------------------
# Wrappers (glue)
# -----------------------------------------------------------------------------
def _vec(p):
    return p.reshape(1, -1)


def _rep2(shape):
    """Replicated 2-D operand (same block every grid step)."""
    return pl.BlockSpec(shape, lambda b: (0, 0))


def _dft_mats(n):
    idx = np.arange(n)
    ang = 2.0 * np.pi * np.outer(idx, idx) / n
    return (jnp.asarray(np.cos(ang), jnp.float32),
            jnp.asarray(np.sin(ang), jnp.float32))


def encoder_layer(x, p, dft):
    B, L, D = x.shape
    cl, sl, cd, sd = dft
    x_spec = pl.BlockSpec((1, L, D), lambda b: (b, 0, 0))
    args = [x, cl, sl, cd, sd,
            p["ff1_w"], _vec(p["ff1_b"]), p["ff2_w"], _vec(p["ff2_b"]),
            _vec(p["ln1_g"]), _vec(p["ln1_b"]),
            _vec(p["ln2_g"]), _vec(p["ln2_b"])]
    in_specs = [x_spec] + [_rep2(a.shape) for a in args[1:]]
    return pl.pallas_call(
        _encoder_layer_kernel,
        grid=(B,),
        in_specs=in_specs,
        out_specs=x_spec,
        out_shape=jax.ShapeDtypeStruct((B, L, D), jnp.float32),
        compiler_params=pltpu.CompilerParams(dimension_semantics=("parallel",)),
    )(*args)


def decoder_layer(y, ctx, p, *, H, dk, project_context, write_attn):
    B, Ly, D = y.shape
    dinner = H * dk
    scale = 1.0 / np.sqrt(dk)

    y_spec = pl.BlockSpec((1, Ly, D), lambda b: (b, 0, 0))
    inputs = [y]
    in_specs = [y_spec]
    if project_context:
        enc = ctx                                        # (B, Lx, D)
        Lx = enc.shape[1]
        inputs.append(enc)
        in_specs.append(pl.BlockSpec((1, Lx, D), lambda b: (b, 0, 0)))
    else:
        k_ctx, v_ctx = ctx                               # (B, Lx, dinner) each
        Lx = k_ctx.shape[1]
        ctx_spec = pl.BlockSpec((1, Lx, dinner), lambda b: (b, 0, 0))
        inputs += [k_ctx, v_ctx]
        in_specs += [ctx_spec, ctx_spec]

    wnames = ["s_wq", "s_bq", "s_wv", "s_bv", "s_wo", "s_bo", "c_wq", "c_bq"]
    if project_context:
        wnames += ["c_wk", "c_bk", "c_wv", "c_bv"]
    wnames += ["c_wo", "c_bo", "ff1_w", "ff1_b", "ff2_w", "ff2_b",
               "ln1_g", "ln1_b", "ln2_g", "ln2_b", "ln3_g", "ln3_b"]
    for n in wnames:
        a = p[n]
        if a.ndim == 1:
            a = _vec(a)
        inputs.append(a)
        in_specs.append(_rep2(a.shape))

    out_shapes = [jax.ShapeDtypeStruct((B, Ly, D), jnp.float32)]
    out_specs = [y_spec]
    if project_context:
        ctx_spec = pl.BlockSpec((1, Lx, dinner), lambda b: (b, 0, 0))
        out_shapes += [jax.ShapeDtypeStruct((B, Lx, dinner), jnp.float32)] * 2
        out_specs += [ctx_spec, ctx_spec]
    if write_attn:
        out_shapes.append(jax.ShapeDtypeStruct((B, H, Ly, Lx), jnp.float32))
        out_specs.append(pl.BlockSpec((1, H, Ly, Lx), lambda b: (b, 0, 0, 0)))

    outs = pl.pallas_call(
        functools.partial(_decoder_layer_kernel,
                          project_context=project_context,
                          write_attn=write_attn, H=H, dk=dk, scale=scale),
        grid=(B,),
        in_specs=in_specs,
        out_specs=tuple(out_specs),
        out_shape=tuple(out_shapes),
        scratch_shapes=[pltpu.VMEM((Ly, dinner), jnp.float32),
                        pltpu.VMEM((Ly, dinner), jnp.float32)],
        compiler_params=pltpu.CompilerParams(dimension_semantics=("parallel",)),
    )(*inputs)
    if not isinstance(outs, (tuple, list)):
        outs = (outs,)
    outs = list(outs)

    y_out = outs.pop(0)
    new_ctx = None
    if project_context:
        k_ctx = outs.pop(0)
        v_ctx = outs.pop(0)
        new_ctx = (k_ctx, v_ctx)
    attn = outs.pop(0) if write_attn else None
    return y_out, new_ctx, attn


def tied_logits(y, emb, scale):
    B, Ly, D = y.shape
    V = emb.shape[0]
    return pl.pallas_call(
        functools.partial(_logits_kernel, scale=scale),
        grid=(B,),
        in_specs=[pl.BlockSpec((1, Ly, D), lambda b: (b, 0, 0)),
                  pl.BlockSpec((V, D), lambda b: (0, 0))],
        out_specs=pl.BlockSpec((1, Ly, V), lambda b: (b, 0, 0)),
        out_shape=jax.ShapeDtypeStruct((B, Ly, V), jnp.float32),
        compiler_params=pltpu.CompilerParams(dimension_semantics=("parallel",)),
    )(y, emb)


# -----------------------------------------------------------------------------
# Parameters / positional encoding
# -----------------------------------------------------------------------------
def make_pe(max_len, dmodel):
    pos = np.arange(max_len)[:, None].astype(np.float64)
    power = np.exp(np.arange(0, dmodel, 2) * (-np.log(10000.0) / dmodel))
    tmp = pos * power
    pe = np.zeros((max_len, dmodel), np.float32)
    pe[:, 0::2] = np.sin(tmp)
    pe[:, 1::2] = np.cos(tmp)
    return jnp.asarray(pe)


def init_params(key, *, vocab, max_len1, max_len2, dmodel, dk, dhead, dff, nlayer):
    keys = iter(jax.random.split(key, 16 + 32 * nlayer))

    def w(shape, scale=0.02):
        return scale * jax.random.normal(next(keys), shape, dtype=jnp.float32)

    zeros = lambda s: jnp.zeros(s, jnp.float32)
    ones = lambda s: jnp.ones(s, jnp.float32)
    dinner = dk * dhead

    params = {
        "embedding": w((vocab, dmodel), 1.0 / np.sqrt(dmodel)),
        "pe1": make_pe(max_len1, dmodel),
        "pe2": make_pe(max_len2, dmodel),
        "encoders": [],
        "decoders": [],
        "cfg": {"dk": dk, "dhead": dhead, "dmodel": dmodel},
    }
    for _ in range(nlayer):
        params["encoders"].append({
            "ff1_w": w((dmodel, dff)), "ff1_b": zeros((dff,)),
            "ff2_w": w((dff, dmodel)), "ff2_b": zeros((dmodel,)),
            "ln1_g": ones((dmodel,)), "ln1_b": zeros((dmodel,)),
            "ln2_g": ones((dmodel,)), "ln2_b": zeros((dmodel,)),
        })
    for i in range(nlayer):
        dec = {
            # self attention (share_weight=True -> Wk shared with Wq)
            "s_wq": w((dmodel, dinner)), "s_bq": zeros((dinner,)),
            "s_wv": w((dmodel, dinner)), "s_bv": zeros((dinner,)),
            "s_wo": w((dinner, dmodel)), "s_bo": zeros((dmodel,)),
            # cross (linear) attention
            "c_wq": w((dmodel, dinner)), "c_bq": zeros((dinner,)),
            "c_wo": w((dinner, dmodel)), "c_bo": zeros((dmodel,)),
            # feed-forward
            "ff1_w": w((dmodel, dff)), "ff1_b": zeros((dff,)),
            "ff2_w": w((dff, dmodel)), "ff2_b": zeros((dmodel,)),
            # layer norms
            "ln1_g": ones((dmodel,)), "ln1_b": zeros((dmodel,)),
            "ln2_g": ones((dmodel,)), "ln2_b": zeros((dmodel,)),
            "ln3_g": ones((dmodel,)), "ln3_b": zeros((dmodel,)),
        }
        if i == 0:  # only the first decoder layer projects K, V (share_context)
            dec["c_wk"] = w((dmodel, dinner)); dec["c_bk"] = zeros((dinner,))
            dec["c_wv"] = w((dmodel, dinner)); dec["c_bv"] = zeros((dinner,))
        params["decoders"].append(dec)
    return params


# -----------------------------------------------------------------------------
# Model forward
# -----------------------------------------------------------------------------
def transformer_lm_forward(params, x_tok, y_tok):
    cfg = params["cfg"]
    dk, H, dmodel = cfg["dk"], cfg["dhead"], cfg["dmodel"]

    # ---------------- encoder ----------------
    x = params["embedding"][x_tok]                       # (B, Lx, D)  glue gather
    x = x + params["pe1"][: x.shape[1]]                  # dropout = identity (eval)
    Lx = x.shape[1]
    cl, sl = _dft_mats(Lx)
    cd, sd = _dft_mats(dmodel)
    dft = (cl, sl, cd, sd)
    for enc in params["encoders"]:
        x = encoder_layer(x, enc, dft)                   # fused F_Attn+LN+FFN+LN
    enc_out = x

    # ---------------- decoder ----------------
    y = params["embedding"][y_tok]                       # (B, Ly, D)
    y = y + params["pe2"][: y.shape[1]]
    nlayer = len(params["decoders"])
    ctx = enc_out
    attn = None
    for i, dec in enumerate(params["decoders"]):
        y, new_ctx, a = decoder_layer(
            y, ctx, dec, H=H, dk=dk,
            project_context=(i == 0),                    # layer 0 builds (k, v)
            write_attn=(i == nlayer - 1))                # only last attn returned
        if new_ctx is not None:
            ctx = new_ctx
        if a is not None:
            attn = a

    # tied output projection (weight = embedding), no bias, scaled in-kernel
    logits = tied_logits(y, params["embedding"], scale=1.0 / np.sqrt(dmodel))
    return logits, attn

    # TODO(synk): for long sequences a flash-style KV-tiled self-attention and
    # an M/N/K-tiled dense pipeline would replace the whole-block kernels.


# -----------------------------------------------------------------------------
# Main
# -----------------------------------------------------------------------------
if __name__ == "__main__":
    vocab_size, max_len1, max_len2 = 50, 16, 16
    dmodel, dk, dhead, dff, nlayer = 32, 8, 4, 64, 2
    B, Lx, Ly = 2, 16, 8

    key = jax.random.PRNGKey(0)
    pkey, xkey, ykey = jax.random.split(key, 3)

    params = init_params(pkey, vocab=vocab_size, max_len1=max_len1,
                         max_len2=max_len2, dmodel=dmodel, dk=dk,
                         dhead=dhead, dff=dff, nlayer=nlayer)

    x_tok = jax.random.randint(xkey, (B, Lx), 0, vocab_size, dtype=jnp.int32)
    y_tok = jax.random.randint(ykey, (B, Ly), 0, vocab_size, dtype=jnp.int32)

    logits, attn = transformer_lm_forward(params, x_tok, y_tok)
    jax.block_until_ready((logits, attn))

    assert logits.shape == (B, Ly, vocab_size), logits.shape
    assert attn.shape == (B, dhead, Ly, Lx), attn.shape
    assert bool(jnp.all(jnp.isfinite(logits)))
    assert bool(jnp.all(jnp.isfinite(attn)))
    print("KERNEL_OK")
</pallas_src>

<mosaic_0001>
module attributes {stable_mosaic.version = 11 : i64} {
  func.func @_encoder_layer_kernel(%arg0: i32, %arg1: memref<1x16x32xf32, #tpu.memory_space<vmem>>, %arg2: memref<16x16xf32, #tpu.memory_space<vmem>>, %arg3: memref<16x16xf32, #tpu.memory_space<vmem>>, %arg4: memref<32x32xf32, #tpu.memory_space<vmem>>, %arg5: memref<32x32xf32, #tpu.memory_space<vmem>>, %arg6: memref<32x64xf32, #tpu.memory_space<vmem>>, %arg7: memref<1x64xf32, #tpu.memory_space<vmem>>, %arg8: memref<64x32xf32, #tpu.memory_space<vmem>>, %arg9: memref<1x32xf32, #tpu.memory_space<vmem>>, %arg10: memref<1x32xf32, #tpu.memory_space<vmem>>, %arg11: memref<1x32xf32, #tpu.memory_space<vmem>>, %arg12: memref<1x32xf32, #tpu.memory_space<vmem>>, %arg13: memref<1x32xf32, #tpu.memory_space<vmem>>, %arg14: memref<1x16x32xf32, #tpu.memory_space<vmem>>) attributes {dimension_semantics = [#tpu.dimension_semantics<parallel>], iteration_bounds = array<i64: 2>, scalar_prefetch = 0 : i64, scratch_operands = 0 : i64, tpu.core_type = #tpu.core_type<tc>, window_params = [{transform_indices = @transform_0, window_bounds = array<i64: 1, 16, 32>}, {pipeline_mode = #tpu.pipeline_mode<synchronous>, transform_indices = @transform_1, window_bounds = array<i64: 16, 16>}, {pipeline_mode = #tpu.pipeline_mode<synchronous>, transform_indices = @transform_2, window_bounds = array<i64: 16, 16>}, {pipeline_mode = #tpu.pipeline_mode<synchronous>, transform_indices = @transform_3, window_bounds = array<i64: 32, 32>}, {pipeline_mode = #tpu.pipeline_mode<synchronous>, transform_indices = @transform_4, window_bounds = array<i64: 32, 32>}, {pipeline_mode = #tpu.pipeline_mode<synchronous>, transform_indices = @transform_5, window_bounds = array<i64: 32, 64>}, {pipeline_mode = #tpu.pipeline_mode<synchronous>, transform_indices = @transform_6, window_bounds = array<i64: 1, 64>}, {pipeline_mode = #tpu.pipeline_mode<synchronous>, transform_indices = @transform_7, window_bounds = array<i64: 64, 32>}, {pipeline_mode = #tpu.pipeline_mode<synchronous>, transform_indices = @transform_8, window_bounds = array<i64: 1, 32>}, {pipeline_mode = #tpu.pipeline_mode<synchronous>, transform_indices = @transform_9, window_bounds = array<i64: 1, 32>}, {pipeline_mode = #tpu.pipeline_mode<synchronous>, transform_indices = @transform_10, window_bounds = array<i64: 1, 32>}, {pipeline_mode = #tpu.pipeline_mode<synchronous>, transform_indices = @transform_11, window_bounds = array<i64: 1, 32>}, {pipeline_mode = #tpu.pipeline_mode<synchronous>, transform_indices = @transform_12, window_bounds = array<i64: 1, 32>}, {transform_indices = @transform_13, window_bounds = array<i64: 1, 16, 32>}]} {
    %c0 = arith.constant 0 : index
    %c0_0 = arith.constant 0 : index
    %c0_1 = arith.constant 0 : index
    %0 = vector.load %arg1[%c0, %c0_0, %c0_1] : memref<1x16x32xf32, #tpu.memory_space<vmem>>, vector<1x16x32xf32>
    %1 = vector.shape_cast %0 : vector<1x16x32xf32> to vector<16x32xf32>
    %c0_2 = arith.constant 0 : index
    %c0_3 = arith.constant 0 : index
    %2 = vector.load %arg2[%c0_2, %c0_3] : memref<16x16xf32, #tpu.memory_space<vmem>>, vector<16x16xf32>
    %cst = arith.constant dense<0.000000e+00> : vector<16x32xf32>
    %3 = tpu.matmul %2, %1, %cst {dimension_numbers = #tpu.dot_dimension_numbers<[1], [0], [0], [1], [0, 0, 1, 1], [], []>} : vector<16x16xf32>, vector<16x32xf32>, vector<16x32xf32> -> vector<16x32xf32>
    %c0_4 = arith.constant 0 : index
    %c0_5 = arith.constant 0 : index
    %4 = vector.load %arg4[%c0_4, %c0_5] : memref<32x32xf32, #tpu.memory_space<vmem>>, vector<32x32xf32>
    %cst_6 = arith.constant dense<0.000000e+00> : vector<16x32xf32>
    %5 = tpu.matmul %3, %4, %cst_6 {dimension_numbers = #tpu.dot_dimension_numbers<[1], [0], [0], [1], [0, 0, 1, 1], [], []>} : vector<16x32xf32>, vector<32x32xf32>, vector<16x32xf32> -> vector<16x32xf32>
    %c0_7 = arith.constant 0 : index
    %c0_8 = arith.constant 0 : index
    %6 = vector.load %arg3[%c0_7, %c0_8] : memref<16x16xf32, #tpu.memory_space<vmem>>, vector<16x16xf32>
    %cst_9 = arith.constant dense<0.000000e+00> : vector<16x32xf32>
    %7 = tpu.matmul %6, %1, %cst_9 {dimension_numbers = #tpu.dot_dimension_numbers<[1], [0], [0], [1], [0, 0, 1, 1], [], []>} : vector<16x16xf32>, vector<16x32xf32>, vector<16x32xf32> -> vector<16x32xf32>
    %c0_10 = arith.constant 0 : index
    %c0_11 = arith.constant 0 : index
    %8 = vector.load %arg5[%c0_10, %c0_11] : memref<32x32xf32, #tpu.memory_space<vmem>>, vector<32x32xf32>
    %cst_12 = arith.constant dense<0.000000e+00> : vector<16x32xf32>
    %9 = tpu.matmul %7, %8, %cst_12 {dimension_numbers = #tpu.dot_dimension_numbers<[1], [0], [0], [1], [0, 0, 1, 1], [], []>} : vector<16x32xf32>, vector<32x32xf32>, vector<16x32xf32> -> vector<16x32xf32>
    %10 = arith.subf %5, %9 : vector<16x32xf32>
    %11 = arith.addf %10, %1 : vector<16x32xf32>
    %c0_13 = arith.constant 0 : index
    %c0_14 = arith.constant 0 : index
    %12 = vector.load %arg10[%c0_13, %c0_14] : memref<1x32xf32, #tpu.memory_space<vmem>>, vector<1x32xf32>
    %c0_15 = arith.constant 0 : index
    %c0_16 = arith.constant 0 : index
    %13 = vector.load %arg11[%c0_15, %c0_16] : memref<1x32xf32, #tpu.memory_space<vmem>>, vector<1x32xf32>
    %cst_17 = arith.constant dense<0.000000e+00> : vector<16xf32>
    %14 = vector.multi_reduction <add>, %11, %cst_17 [1] : vector<16x32xf32> to vector<16xf32>
    %15 = vector.shape_cast %14 : vector<16xf32> to vector<16x1xf32>
    %cst_18 = arith.constant 3.200000e+01 : f32
    %16 = vector.broadcast %cst_18 : f32 to vector<16x1xf32>
    %17 = arith.divf %15, %16 : vector<16x1xf32>
    %18 = vector.broadcast %17 : vector<16x1xf32> to vector<16x32xf32>
    %19 = arith.subf %11, %18 : vector<16x32xf32>
    %20 = arith.mulf %19, %19 : vector<16x32xf32>
    %cst_19 = arith.constant dense<0.000000e+00> : vector<16xf32>
    %21 = vector.multi_reduction <add>, %20, %cst_19 [1] : vector<16x32xf32> to vector<16xf32>
    %22 = vector.shape_cast %21 : vector<16xf32> to vector<16x1xf32>
    %cst_20 = arith.constant 3.200000e+01 : f32
    %23 = vector.broadcast %cst_20 : f32 to vector<16x1xf32>
    %24 = arith.divf %22, %23 : vector<16x1xf32>
    %25 = vector.broadcast %17 : vector<16x1xf32> to vector<16x32xf32>
    %26 = arith.subf %11, %25 : vector<16x32xf32>
    %cst_21 = arith.constant 9.99999974E-6 : f32
    %27 = vector.broadcast %cst_21 : f32 to vector<16x1xf32>
    %28 = arith.addf %24, %27 : vector<16x1xf32>
    %29 = math.rsqrt %28 : vector<16x1xf32>
    %30 = vector.broadcast %29 : vector<16x1xf32> to vector<16x32xf32>
    %31 = arith.mulf %26, %30 : vector<16x32xf32>
    %32 = vector.broadcast %12 : vector<1x32xf32> to vector<16x32xf32>
    %33 = arith.mulf %31, %32 : vector<16x32xf32>
    %34 = vector.broadcast %13 : vector<1x32xf32> to vector<16x32xf32>
    %35 = arith.addf %33, %34 : vector<16x32xf32>
    %c0_22 = arith.constant 0 : index
    %c0_23 = arith.constant 0 : index
    %36 = vector.load %arg6[%c0_22, %c0_23] : memref<32x64xf32, #tpu.memory_space<vmem>>, vector<32x64xf32>
    %cst_24 = arith.constant dense<0.000000e+00> : vector<16x64xf32>
    %37 = tpu.matmul %35, %36, %cst_24 {dimension_numbers = #tpu.dot_dimension_numbers<[1], [0], [0], [1], [0, 0, 1, 1], [], []>} : vector<16x32xf32>, vector<32x64xf32>, vector<16x64xf32> -> vector<16x64xf32>
    %c0_25 = arith.constant 0 : index
    %c0_26 = arith.constant 0 : index
    %38 = vector.load %arg7[%c0_25, %c0_26] : memref<1x64xf32, #tpu.memory_space<vmem>>, vector<1x64xf32>
    %39 = vector.broadcast %38 : vector<1x64xf32> to vector<16x64xf32>
    %40 = arith.addf %37, %39 : vector<16x64xf32>
    %cst_27 = arith.constant 0.000000e+00 : f32
    %41 = vector.broadcast %cst_27 : f32 to vector<16x64xf32>
    %42 = arith.maximumf %40, %41 : vector<16x64xf32>
    %c0_28 = arith.constant 0 : index
    %c0_29 = arith.constant 0 : index
    %43 = vector.load %arg8[%c0_28, %c0_29] : memref<64x32xf32, #tpu.memory_space<vmem>>, vector<64x32xf32>
    %cst_30 = arith.constant dense<0.000000e+00> : vector<16x32xf32>
    %44 = tpu.matmul %42, %43, %cst_30 {dimension_numbers = #tpu.dot_dimension_numbers<[1], [0], [0], [1], [0, 0, 1, 1], [], []>} : vector<16x64xf32>, vector<64x32xf32>, vector<16x32xf32> -> vector<16x32xf32>
    %c0_31 = arith.constant 0 : index
    %c0_32 = arith.constant 0 : index
    %45 = vector.load %arg9[%c0_31, %c0_32] : memref<1x32xf32, #tpu.memory_space<vmem>>, vector<1x32xf32>
    %46 = vector.broadcast %45 : vector<1x32xf32> to vector<16x32xf32>
    %47 = arith.addf %44, %46 : vector<16x32xf32>
    %48 = arith.addf %47, %35 : vector<16x32xf32>
    %c0_33 = arith.constant 0 : index
    %c0_34 = arith.constant 0 : index
    %49 = vector.load %arg12[%c0_33, %c0_34] : memref<1x32xf32, #tpu.memory_space<vmem>>, vector<1x32xf32>
    %c0_35 = arith.constant 0 : index
    %c0_36 = arith.constant 0 : index
    %50 = vector.load %arg13[%c0_35, %c0_36] : memref<1x32xf32, #tpu.memory_space<vmem>>, vector<1x32xf32>
    %cst_37 = arith.constant dense<0.000000e+00> : vector<16xf32>
    %51 = vector.multi_reduction <add>, %48, %cst_37 [1] : vector<16x32xf32> to vector<16xf32>
    %52 = vector.shape_cast %51 : vector<16xf32> to vector<16x1xf32>
    %cst_38 = arith.constant 3.200000e+01 : f32
    %53 = vector.broadcast %cst_38 : f32 to vector<16x1xf32>
    %54 = arith.divf %52, %53 : vector<16x1xf32>
    %55 = vector.broadcast %54 : vector<16x1xf32> to vector<16x32xf32>
    %56 = arith.subf %48, %55 : vector<16x32xf32>
    %57 = arith.mulf %56, %56 : vector<16x32xf32>
    %cst_39 = arith.constant dense<0.000000e+00> : vector<16xf32>
    %58 = vector.multi_reduction <add>, %57, %cst_39 [1] : vector<16x32xf32> to vector<16xf32>
    %59 = vector.shape_cast %58 : vector<16xf32> to vector<16x1xf32>
    %cst_40 = arith.constant 3.200000e+01 : f32
    %60 = vector.broadcast %cst_40 : f32 to vector<16x1xf32>
    %61 = arith.divf %59, %60 : vector<16x1xf32>
    %62 = vector.broadcast %54 : vector<16x1xf32> to vector<16x32xf32>
    %63 = arith.subf %48, %62 : vector<16x32xf32>
    %cst_41 = arith.constant 9.99999974E-6 : f32
    %64 = vector.broadcast %cst_41 : f32 to vector<16x1xf32>
    %65 = arith.addf %61, %64 : vector<16x1xf32>
    %66 = math.rsqrt %65 : vector<16x1xf32>
    %67 = vector.broadcast %66 : vector<16x1xf32> to vector<16x32xf32>
    %68 = arith.mulf %63, %67 : vector<16x32xf32>
    %69 = vector.broadcast %49 : vector<1x32xf32> to vector<16x32xf32>
    %70 = arith.mulf %68, %69 : vector<16x32xf32>
    %71 = vector.broadcast %50 : vector<1x32xf32> to vector<16x32xf32>
    %72 = arith.addf %70, %71 : vector<16x32xf32>
    %c0_42 = arith.constant 0 : index
    %c0_43 = arith.constant 0 : index
    %c0_44 = arith.constant 0 : index
    %73 = vector.load %arg14[%c0_42, %c0_43, %c0_44] : memref<1x16x32xf32, #tpu.memory_space<vmem>>, vector<1x16x32xf32>
    %74 = vector.shape_cast %73 : vector<1x16x32xf32> to vector<16x32xf32>
    %75 = vector.shape_cast %72 : vector<16x32xf32> to vector<1x16x32xf32>
    tpu.vector_store %arg14[%c0_42, %c0_43, %c0_44], %75 {strides = array<i32>} : memref<1x16x32xf32, #tpu.memory_space<vmem>>, vector<1x16x32xf32>,
    return
  }
  func.func @transform_0(%arg0: i32) -> (i32, i32, i32) {
    %c0_i32 = arith.constant 0 : i32
    %c0_i32_0 = arith.constant 0 : i32
    %c0_i32_1 = arith.constant 0 : i32
    return %arg0, %c0_i32, %c0_i32_0 : i32, i32, i32
  }
  func.func @transform_1(%arg0: i32) -> (i32, i32) {
    %c0_i32 = arith.constant 0 : i32
    %c0_i32_0 = arith.constant 0 : i32
    %c0_i32_1 = arith.constant 0 : i32
    return %c0_i32, %c0_i32_0 : i32, i32
  }
  func.func @transform_2(%arg0: i32) -> (i32, i32) {
    %c0_i32 = arith.constant 0 : i32
    %c0_i32_0 = arith.constant 0 : i32
    %c0_i32_1 = arith.constant 0 : i32
    return %c0_i32, %c0_i32_0 : i32, i32
  }
  func.func @transform_3(%arg0: i32) -> (i32, i32) {
    %c0_i32 = arith.constant 0 : i32
    %c0_i32_0 = arith.constant 0 : i32
    %c0_i32_1 = arith.constant 0 : i32
    return %c0_i32, %c0_i32_0 : i32, i32
  }
  func.func @transform_4(%arg0: i32) -> (i32, i32) {
    %c0_i32 = arith.constant 0 : i32
    %c0_i32_0 = arith.constant 0 : i32
    %c0_i32_1 = arith.constant 0 : i32
    return %c0_i32, %c0_i32_0 : i32, i32
  }
  func.func @transform_5(%arg0: i32) -> (i32, i32) {
    %c0_i32 = arith.constant 0 : i32
    %c0_i32_0 = arith.constant 0 : i32
    %c0_i32_1 = arith.constant 0 : i32
    return %c0_i32, %c0_i32_0 : i32, i32
  }
  func.func @transform_6(%arg0: i32) -> (i32, i32) {
    %c0_i32 = arith.constant 0 : i32
    %c0_i32_0 = arith.constant 0 : i32
    %c0_i32_1 = arith.constant 0 : i32
    return %c0_i32, %c0_i32_0 : i32, i32
  }
  func.func @transform_7(%arg0: i32) -> (i32, i32) {
    %c0_i32 = arith.constant 0 : i32
    %c0_i32_0 = arith.constant 0 : i32
    %c0_i32_1 = arith.constant 0 : i32
    return %c0_i32, %c0_i32_0 : i32, i32
  }
  func.func @transform_8(%arg0: i32) -> (i32, i32) {
    %c0_i32 = arith.constant 0 : i32
    %c0_i32_0 = arith.constant 0 : i32
    %c0_i32_1 = arith.constant 0 : i32
    return %c0_i32, %c0_i32_0 : i32, i32
  }
  func.func @transform_9(%arg0: i32) -> (i32, i32) {
    %c0_i32 = arith.constant 0 : i32
    %c0_i32_0 = arith.constant 0 : i32
    %c0_i32_1 = arith.constant 0 : i32
    return %c0_i32, %c0_i32_0 : i32, i32
  }
  func.func @transform_10(%arg0: i32) -> (i32, i32) {
    %c0_i32 = arith.constant 0 : i32
    %c0_i32_0 = arith.constant 0 : i32
    %c0_i32_1 = arith.constant 0 : i32
    return %c0_i32, %c0_i32_0 : i32, i32
  }
  func.func @transform_11(%arg0: i32) -> (i32, i32) {
    %c0_i32 = arith.constant 0 : i32
    %c0_i32_0 = arith.constant 0 : i32
    %c0_i32_1 = arith.constant 0 : i32
    return %c0_i32, %c0_i32_0 : i32, i32
  }
  func.func @transform_12(%arg0: i32) -> (i32, i32) {
    %c0_i32 = arith.constant 0 : i32
    %c0_i32_0 = arith.constant 0 : i32
    %c0_i32_1 = arith.constant 0 : i32
    return %c0_i32, %c0_i32_0 : i32, i32
  }
  func.func @transform_13(%arg0: i32) -> (i32, i32, i32) {
    %c0_i32 = arith.constant 0 : i32
    %c0_i32_0 = arith.constant 0 : i32
    %c0_i32_1 = arith.constant 0 : i32
    return %arg0, %c0_i32, %c0_i32_0 : i32, i32, i32
  }
}

</mosaic_0001>

<bundles_post_ra>
// kernel: tpu_custom_call.1
= control target key start
LH: loop header
LB: loop body
LE: loop exit
PB: predicated region body
PF: predicated region fallthrough
CT: control target
= control target key end

     0   :  { %s2020_s0 = inlined_call_operand.vmem [shape: f32[2,16,32], index: 0, kind: input, shape index: {}]   ;;  %s2021_s1 = inlined_call_operand.hbm [shape: f32[16,16], index: 1, kind: input, shape index: {}]   ;;  %s2022_s2 = inlined_call_operand.hbm [shape: f32[16,16], index: 2, kind: input, shape index: {}]   ;;  %s2023_s3 = inlined_call_operand.vmem [shape: f32[32,32], index: 3, kind: input, shape index: {}]   ;;  %s2024_s4 = inlined_call_operand.vmem [shape: f32[32,32], index: 4, kind: input, shape index: {}]   ;;  %s2025_s5 = inlined_call_operand.hbm [shape: f32[32,64], index: 5, kind: input, shape index: {}]   ;;  %s2026_s6 = inlined_call_operand.vmem [shape: f32[1,64], index: 6, kind: input, shape index: {}]   ;;  %s2027_s7 = inlined_call_operand.vmem [shape: f32[64,32], index: 7, kind: input, shape index: {}]   ;;  %s2028_s8 = inlined_call_operand.vmem [shape: f32[1,32], index: 8, kind: input, shape index: {}]   ;;  %s2029_s9 = inlined_call_operand.vmem [shape: f32[1,32], index: 9, kind: input, shape index: {}]   ;;  %s2030_s10 = inlined_call_operand.vmem [shape: f32[1,32], index: 10, kind: input, shape index: {}]   ;;  %s2031_s11 = inlined_call_operand.vmem [shape: f32[1,32], index: 11, kind: input, shape index: {}]   ;;  %s2032_s12 = inlined_call_operand.vmem [shape: f32[1,32], index: 12, kind: input, shape index: {}]   ;;  %s2033_s13 = inlined_call_operand.hbm [shape: f32[2,16,32], index: 13, kind: output, shape index: {}]  }
   0x1   :  { %2046 = sst [smem:[#allocation19_spill]] %s2032_s12 }
   0x2   :  { %2047 = sst [smem:[#allocation20_spill]] %s2033_s13 }
   0x3   :  { %18 = vsyncpa [#allocation3], 0 }
   0x4   :  { %19 = vsyncpa [#allocation6], 0 }
   0x5   :  { %20 = vsyncpa [#allocation4], 0 }
   0x6   :  { %22 = vsyncpa [#allocation4 + $0x1], 0  ;;  %s1722_s25 = smov 0   ;;  %s1724_s26 = smov 0  }
   0x7   :  { %s1726_s27 = smov 0   ;;  %s1728_s28 = smov 0  }
   0x8 LB: > { %2048 = sst [smem:[#allocation12_spill]] %s1630_s25  ;;  %s1743_s29 = sadd.s32 4294967295, %s1642_s28   ;;  %s1642_s28 = sphi %s1728_s28, %s2074_s28   ;;  %s1638_s27 = sphi %s1726_s27, %s2076_s27   ;;  %s1634_s26 = sphi %s1724_s26, %s2078_s26   ;;  %s1630_s25 = sphi %s1722_s25, %s2077_s25  }
   0x9   : > { %2049 = sst [smem:[#allocation13_spill]] %s1638_s27  ;;  %s1218_s30 = sadd.s32 4294967294, %s1642_s28  }
   0xa   : > { %2050 = sst [smem:[#allocation14_spill]] %s1642_s28  ;;  %s1747_s14 = sadd.s32 1, %s1642_s28  }
   0xb   : > { %2051 = sst [smem:[#allocation15_spill]] %s1747_s14  ;;  %s313_s15 = sadd.s32 1, %s1638_s27 }
   0xc   : > { %s310_s16 = ssub.s32 %s1642_s28, %s1747_s14  ;;  %p323_p0 = scmp.ne.s32.totalorder %s1638_s27, %s1634_s26 }
   0xd   : > { %p311_p1 = scmp.eq.s32.totalorder %s310_s16, 0  ;;  %p324_p2 = scmp.eq.s32.totalorder %s1743_s29, 1 }
   0xe   : > { %p329_p3 = scmp.ne.s32.totalorder %s1634_s26, %s1630_s25  ;;  %p330_p4 = scmp.eq.s32.totalorder %s1218_s30, 1 }
   0xf   : > { %s1758_s17 = scalar_select %p311_p1, %s1638_s27, %s313_s15  }
  0x10   : > { %p1760_p5 = por %p324_p2, %p323_p0  ;;  %p1764_p6 = por %p330_p4, %p329_p3 }
  0x11   : > { %2052 = sst [smem:[#allocation16_spill]] %s1758_s17  ;;  %p1219_p7 = scmp.ge.s32.totalorder %s1642_s28, 1 }
  0x12   : > { %s2053_s18 = scalar_select %p1760_p5, 1, 0 }
  0x13   : > { %s2055_s19 = scalar_select %p1764_p6, 1, 0 }
  0x14   : > { %2054 = sst [smem:[#allocation17_spill]] %s2053_s18  ;;  %p337_p8 = scmp.lt.s32.totalorder %s1642_s28, 3 }
  0x15   : > { %2056 = sst [smem:[#allocation18_spill]] %s2055_s19  ;;  %p2039_p9 = scmp.eq.s32.totalorder %s1743_s29, 0 }
  0x16   : > { %p1771_p10 = pnand %p1219_p7, %p337_p8  ;;  %s1644_s21 = smov [#allocation5]  }
  0x17   : > { %s362_s22 = sshll.u32 %s1644_s21, 4  ;;  %s1645_s24 = smov [#allocation2]   ;;  %s1777_s22 = int_to_ptr.vmem [resolvable:$true] %s362_s22 }
  0x18   : > { %s2057_s20 = scalar_select %p1771_p10, 1, 0 }
  0x19   : > { %p1420_p11 = pneg %p1771_p10  ;;  %s349_s30 = sshll.u32 %s1645_s24, 4  ;;  %s1785_s30 = int_to_ptr.vmem [resolvable:$true] %s349_s30 }
  0x1a   : > { %s1646_s15 = smov [#allocation7]   ;;  %s1488_s14 = scalar_lea.hbm %s2022_s2, 256 }
  0x1b   : > { %p1781_p12 = pnand %p2039_p9, %p1420_p11  ;;  %s1787_s16 = sshll.u32 %s1646_s15, 4  ;;  %s382_s16 = int_to_ptr.vmem [resolvable:$true] %s1787_s16 }
  0x1c   : > { %p1489_p13 = scmp.ne.s32.totalorder %s2022_s2, %s1488_s14  ;;  %p1495_p3 = scmp.lt.u32.totalorder %s1488_s14, %s2022_s2 }
  0x1d   : > { %p1797_p0 = pneg %p1781_p12 }
  0x1f   : > { %p1491_p1 = pnand %p1797_p0, %p1489_p13 }
  0x21   : > { %p1492_p2 = pneg %p1491_p1 }
  0x23   : > { %p1497_p4 = pnand %p1495_p3, %p1492_p2 }
  0x25   : > { %1500 = shalt.err (!%p1497_p4)
}
  0x26   : > { %s1501_s27 = scalar_lea.vmem %s1777_s22, 256  ;;  %p1509_p9 = scmp.lt.s32.totalorder %s1777_s22, %s1777_s22 }
  0x27   : > { %p1502_p7 = scmp.ne.s32.totalorder %s1777_s22, %s1501_s27  ;;  %p1510_p6 = scmp.lt.s32.totalorder %s1501_s27, %s1501_s27 }
  0x29   : > { %p1504_p8 = pnand %p1502_p7, %p1797_p0  ;;  %p1511_p13 = por %p1510_p6, %p1509_p9 }
  0x2b   : > { %p1505_p11 = pneg %p1504_p8 }
  0x2d   : > { %p1512_p1 = pnand %p1511_p13, %p1505_p11 }
  0x2f   : > { %1515 = shalt.err (!%p1512_p1)
}
  0x30   : > { %s1647_s17 = smov 128   ;;  %s1648_s14 = smov 8  }
  0x31   : > { %1426 = dma.hbm_to_vmem [thread:$0]  (!%p1781_p12), %s2022_s2, 256, %s1777_s22, [#allocation6], %s1647_s17, %s1647_s17, %s1648_s14  }
  0x32   : > { %s1516_s27 = scalar_lea.hbm %s2021_s1, 256 }
  0x33   : > { %p1517_p6 = scmp.ne.s32.totalorder %s2021_s1, %s1516_s27  ;;  %p1523_p3 = scmp.lt.u32.totalorder %s1516_s27, %s2021_s1 }
  0x35   : > { %p1519_p9 = pnand %p1517_p6, %p1797_p0 }
  0x37   : > { %p1520_p2 = pneg %p1519_p9 }
  0x39   : > { %p1525_p4 = pnand %p1523_p3, %p1520_p2 }
  0x3b   : > { %1528 = shalt.err (!%p1525_p4)
}
  0x3c   : > { %s1529_s22 = scalar_lea.vmem %s1785_s30, 256  ;;  %p1537_p13 = scmp.lt.s32.totalorder %s1785_s30, %s1785_s30 }
  0x3d   : > { %p1530_p7 = scmp.ne.s32.totalorder %s1785_s30, %s1529_s22  ;;  %p1538_p1 = scmp.lt.s32.totalorder %s1529_s22, %s1529_s22 }
  0x3f   : > { %p1532_p8 = pnand %p1530_p7, %p1797_p0  ;;  %p1539_p6 = por %p1538_p1, %p1537_p13 }
  0x41   : > { %p1533_p11 = pneg %p1532_p8 }
  0x43   : > { %p1540_p9 = pnand %p1539_p6, %p1533_p11 }
  0x45   : > { %1543 = shalt.err (!%p1540_p9)
}
  0x46   : > { %1423 = dma.hbm_to_vmem [thread:$0]  (!%p1781_p12), %s2021_s1, 256, %s1785_s30, [#allocation3], %s1647_s17, %s1647_s17, %s1648_s14  }
  0x47   : > { %s1544_s19 = scalar_lea.hbm %s2025_s5, 512 }
  0x48   : > { %p1545_p2 = scmp.ne.s32.totalorder %s2025_s5, %s1544_s19  ;;  %p1551_p7 = scmp.lt.u32.totalorder %s1544_s19, %s2025_s5 }
  0x4a   : > { %p1547_p3 = pnand %p1545_p2, %p1797_p0 }
  0x4c   : > { %p1548_p4 = pneg %p1547_p3 }
  0x4e   : > { %p1553_p8 = pnand %p1551_p7, %p1548_p4 }
  0x50   : > { %1556 = shalt.err (!%p1553_p8)
}
  0x51   : > { %s1557_s22 = scalar_lea.vmem %s382_s16, 512  ;;  %p1565_p6 = scmp.lt.s32.totalorder %s382_s16, %s382_s16 }
  0x52   : > { %p1558_p11 = scmp.ne.s32.totalorder %s382_s16, %s1557_s22  ;;  %p1566_p9 = scmp.lt.s32.totalorder %s1557_s22, %s1557_s22 }
  0x54   : > { %p1560_p13 = pnand %p1558_p11, %p1797_p0  ;;  %p1567_p5 = por %p1566_p9, %p1565_p6 }
  0x56   : > { %p1561_p1 = pneg %p1560_p13 }
  0x58   : > { %p1568_p10 = pnand %p1567_p5, %p1561_p1 }
  0x5a   : > { %1571 = shalt.err (!%p1568_p10)
}
  0x5b   : > { %1429 = dma.hbm_to_vmem [thread:$0]  (!%p1781_p12), %s2025_s5, 512, %s382_s16, [#allocation6], %s1647_s17, %s1647_s17, %s1648_s14  }
  0x5c   : > { %p2060_p2 = scmp.ne.s32.totalorder %s2057_s20, 0 }
  0x5d   : > { %p2061_p0 = scmp.eq.s32.totalorder (!%p2060_p2), %s1743_s29, 0 }
  0x5e   : > { %426 = sbr.rel (%p2060_p2) target bundleno = 1637 (0x665), region = 72 }
  0x65   : > { %1617 = dma.done.wait (%p2061_p0), [#allocation3], 256   ;;  %p2062_p3 = pmov %p2061_p0 }
  0x66   : > { %p2063_p5 = pmov %p2061_p0 }
  0x67   : > { %1619 = vsyncadd (%p2062_p3), [#allocation3], 4294967040 }
  0x68   : > { %1621 = dma.done.wait (%p2063_p5), [#allocation6], 768   ;;  %p2064_p10 = pmov %p2061_p0 }
  0x69   : > { %p478_p4 = scmp.lt.s32.totalorder %s1743_s29, 1  ;;  %vm487_vm0 = vcmask 130048   ;;  %v485_v2 = vld [vmem:[#allocation2] sm:$0xff]  ;;  %v570_v5 = vld [vmem:[%s2023_s3 + $0x8] sm:$0xff]  ;;  %v571_v6 = vld [vmem:[%s2023_s3 + $0x10] sm:$0xff]  ;;  %vm573_vm1 = vcmask 261120  }
  0x6a   : > { %1623 = vsyncadd (%p2064_p10), [#allocation6], 4294966528  ;;  %1296 = vmatprep.mubr.msk.f32.mxu0 %vm487_vm0, %v485_v2  ;;  %v569_v4 = vld [vmem:[%s2023_s3] sm:$0xff]  ;;  %v572_v8 = vld [vmem:[%s2023_s3 + $0x18] sm:$0xff]  ;;  %vm981_vm2 = vcmask 523264   ;;  %s475_s24 = sand.u32 1, %s1634_s26  }
  0x6b   : > { %s479_s25 = scalar_select %p478_p4, %s1743_s29, 1  ;;  %v1362_v7 = vpack.c.bf16 %v570_v5, %v569_v4  ;;  %v486_v9 = vld [vmem:[#allocation2 + $0x8] sm:$0xff]  ;;  %v1366_v10 = vpack.c.bf16 %v572_v8, %v571_v6  ;;  %v655_v11 = vld [vmem:[#allocation5] sm:$0xff]  ;;  %v656_v12 = vld [vmem:[#allocation5 + $0x8] sm:$0xff] }
  0x6c   : > { %v738_v13 = vld [vmem:[%s2024_s4] sm:$0xff]  ;;  %v739_v14 = vld [vmem:[%s2024_s4 + $0x8] sm:$0xff]  ;;  %v740_v16 = vld [vmem:[%s2024_s4 + $0x10] sm:$0xff]  ;;  %s1228_s15 = sshll.u32 %s475_s24, 4  ;;  %s1255_s16 = sshll.u32 %s1743_s29, 8 }
  0x6d   : > { %s1254_s23 = sshll.u32 %s479_s25, 4  ;;  %1363 = vmatprep.subr.bf16.mxu1 %v1362_v7  ;;  %v1374_v15 = vpack.c.bf16 %v739_v14, %v738_v13  ;;  %v741_v17 = vld [vmem:[%s2024_s4 + $0x18] sm:$0xff]  ;;  %v872_v43 = vld [vmem:[#allocation7] sm:$0xff]  ;;  %v873_v44 = vld [vmem:[#allocation7 + $0x8] sm:$0xff]  ;;  %s2065_s25 = sld [smem:[#allocation19_spill]] }
  0x6e   : > { %s482_s17 = scalar_lea.vmem %s2020_s0, %s1254_s23  ;;  %1365 = vmatpush3.bf16.msra.mxu1 %v1362_v7  ;;  %v1378_v20 = vpack.c.bf16 %v741_v17, %v740_v16  ;;  %v1382_v45 = vpack.c.bf16 %v873_v44, %v872_v43  ;;  %v874_v46 = vld [vmem:[#allocation7 + $0x10] sm:$0xff]  ;;  %v875_v47 = vld [vmem:[#allocation7 + $0x18] sm:$0xff]  ;;  %v966_v49 = vld [vmem:[%s2027_s7] sm:$0xff]  ;;  %s2066_s23 = sld [smem:[#allocation17_spill]] }
  0x6f   : > { %v483_v0 = vld [vmem:[%s482_s17] sm:$0xff]  ;;  %v484_v1 = vld [vmem:[%s482_s17 + $0x8] sm:$0xff]  ;;  %1367 = vmatprep.subr.bf16.mxu1 %v1366_v10  ;;  %v1386_v48 = vpack.c.bf16 %v875_v47, %v874_v46  ;;  %v968_v51 = vld [vmem:[%s2027_s7 + $0x10] sm:$0xff]  ;;  %s477_s20 = scalar_lea.vmem [#allocation8], %s1228_s15  ;;  %s2067_s28 = sld [smem:[#allocation20_spill]] }
  0x70   : > { %v1358_v3 = vpack.c.bf16 %v484_v1, %v483_v0  ;;  %v967_v50 = vld [vmem:[%s2027_s7 + $0x8] sm:$0xff]  ;;  %v969_v53 = vld [vmem:[%s2027_s7 + $0x18] sm:$0xff]  ;;  %v970_v55 = vld [vmem:[%s2027_s7 + $0x20] sm:$0xff]  ;;  %s1125_s17 = sshll.u32 %s477_s20, 4  ;;  %s1979_s29 = scalar_lea.sflag [#allocation4], %s475_s24  ;;  %s1975_s17 = int_to_ptr.vmem [resolvable:$true] %s1125_s17 }
  0x71   : > { %v1390_v52 = vpack.c.bf16 %v967_v50, %v966_v49  ;;  %v1394_v54 = vpack.c.bf16 %v969_v53, %v968_v51  ;;  %v971_v56 = vld [vmem:[%s2027_s7 + $0x28] sm:$0xff]  ;;  %v1241_v13 = vld [vmem:[%s2026_s6] ss:$0 sm:$0xff]  ;;  %s1572_s21 = scalar_lea.vmem %s1975_s17, 256  ;;  %s1649_s15 = smov [#allocation8]  }
  0x72   : > { %1359 = vmatprep.subr.bf16.mxu0 %v1358_v3  ;;  %1369 = vmatpush3.bf16.msra.mxu1 %v1366_v10  ;;  %v1398_v57 = vpack.c.bf16 %v971_v56, %v970_v55  ;;  %v972_v10 = vld [vmem:[%s2027_s7 + $0x30] sm:$0xff]  ;;  %v1247_v46 = vld [vmem:[%s2031_s11] ss:$0 sm:$0xff]  ;;  %p1573_p12 = scmp.ne.s32.totalorder %s1975_s17, %s1572_s21  ;;  %s1576_s27 = sshll.u32 %s1649_s15, 4  ;;  %s1577_s27 = int_to_ptr.vmem [resolvable:$false] %s1576_s27 }
  0x73   : > { %1361 = vmatpush3.bf16.msra.mxu0 %v1358_v3  ;;  %1375 = vmatprep.subr.bf16.mxu1 %v1374_v15  ;;  %v1248_v49 = vld [vmem:[%s2065_s25] ss:$0 sm:$0xff]  ;;  %s1578_s22 = scalar_lea.vmem %s1577_s27, 512  ;;  %p1579_p13 = scmp.lt.s32.totalorder %s1975_s17, %s1577_s27 }
  0x74   : > { %1371 = vmatprep.subr.bf16.mxu0 %v1358_v3  ;;  %p2069_p7 = scmp.ne.s32.totalorder %s2066_s23, 0  ;;  %p1580_p1 = scmp.lt.s32.totalorder %s1578_s22, %s1572_s21 }
  0x75   : > { %s2068_s18 = smov %s2067_s28  ;;  %s1973_s19 = scalar_lea.hbm %s2067_s28, %s1255_s16 }
  0x76   : > { %1297 = vmatmul.mubr.msk.f32.vlgmr.msra.gmra.mrb[0].mxu0 %vm487_vm0, %v486_v9  ;;  %p1574_p8 = pnand %p1573_p12, %p2069_p7  ;;  %p1581_p6 = por %p1580_p1, %p1579_p13 }
  0x77   : > { %1373 = vmatpush3.bf16.msra.mxu0 %v1358_v3  ;;  %1314 = vmatprep.mubr.msk.f32.mxu0 %vm487_vm0, %v655_v11  ;;  %v1240_v3 = vld [vmem:[%s2030_s10] ss:$0 sm:$0xff]  ;;  %v973_v11 = vld [vmem:[%s2027_s7 + $0x38] sm:$0xff] }
  0x78   : > { %1391 = vmatprep.subr.bf16.mxu0 %v1390_v52  ;;  %p1575_p11 = pneg %p1574_p8 }
  0x7a   : > { %1315 = vmatmul.mubr.msk.f32.vlgmr.msra.gmra.mrb[2].mxu0 %vm487_vm0, %v656_v12  ;;  %v1402_v12 = vpack.c.bf16 %v973_v11, %v972_v10  ;;  %p1582_p9 = pnand %p1581_p6, %p1575_p11 }
  0x7b   : > { %1393 = vmatpush3.bf16.msra.mxu0 %v1390_v52 }
  0x7c   : > { %1395 = vmatprep.subr.bf16.mxu0 %v1394_v54 }
  0x7f   : > { %1397 = vmatpush3.bf16.msra.mxu0 %v1394_v54 }
  0x80   : > { %1399 = vmatprep.subr.bf16.mxu0 %v1398_v57 }
  0x83   : > { %1401 = vmatpush3.bf16.msra.mxu0 %v1398_v57 }
  0x84   : > { %1403 = vmatprep.subr.bf16.mxu0 %v1402_v12 }
  0x87   : > { %1405 = vmatpush3.bf16.msra.mxu0 %v1402_v12 }
 0x149   : > { %v1298_v18 = vpop.f32.mrb[0].mxu0 }
 0x14a   : > { %v560_v19 = vpop.f32.mrb[1].mxu0 }
 0x14b   : > { %1307 = vmatprep.mubr.msk.f32.mxu1 %vm573_vm1, %v560_v19 }
 0x14c   : > { %1308 = vmatmul.mubr.msk.f32.vlgmr.msra.gmra.mrb[0].mxu1 %vm573_vm1, %v1298_v18 }
 0x14d   : > { %1377 = vmatpush3.bf16.msra.mxu1 %v1374_v15  ;;  %v1316_v21 = vpop.f32.mrb[2].mxu0 }
 0x14e   : > { %1379 = vmatprep.subr.bf16.mxu1 %v1378_v20  ;;  %v729_v22 = vpop.f32.mrb[3].mxu0 }
 0x14f   : > { %1325 = vmatprep.mubr.msk.f32.mxu1 %vm573_vm1, %v729_v22 }
 0x151   : > { %1381 = vmatpush3.bf16.msra.mxu1 %v1378_v20  ;;  %v1244_v20 = vld [vmem:[%s2028_s8] ss:$0 sm:$0xff] }
 0x152   : > { %1383 = vmatprep.subr.bf16.mxu1 %v1382_v45 }
 0x154   : > { %1326 = vmatmul.mubr.msk.f32.vlgmr.msra.gmra.mrb[2].mxu1 %vm573_vm1, %v1316_v21 }
 0x155   : > { %1385 = vmatpush3.bf16.msra.mxu1 %v1382_v45 }
 0x156   : > { %1387 = vmatprep.subr.bf16.mxu1 %v1386_v48 }
 0x159   : > { %1389 = vmatpush3.bf16.msra.mxu1 %v1386_v48 }
 0x21f   : > { %v1309_v23 = vpop.f32.mrb[0].mxu1 }
 0x220   : > { %v646_v24 = vpop.f32.mrb[1].mxu1 }
 0x227   : > { %v1327_v25 = vpop.f32.mrb[2].mxu1 }
 0x228   : > { %v824_v26 = vsub.f32 %v1309_v23, %v1327_v25  ;;  %v814_v27 = vpop.f32.mrb[3].mxu1 }
 0x229   : > { %v823_v28 = vsub.f32 %v646_v24, %v814_v27 }
 0x22a   : > { %v826_v31 = vadd.f32 %v824_v26, %v484_v1  ;;  %v1239_v1 = vld [vmem:[%s2029_s9] ss:$0 sm:$0xff] }
 0x22b   : > { %v825_v29 = vadd.f32 %v823_v28, %v483_v0 }
 0x22c   : > { %v832_v32 = vsel %vm573_vm1, %v826_v31, 0.0 }
 0x22d   : > { %v829_v30 = vsel %vm573_vm1, %v825_v29, 0.0 }
 0x22e   : > { %830 = vadd.xlane.f32.xlu0 %v829_v30 }
 0x232   : > { %833 = vadd.xlane.f32.xlu0 %v832_v32 }
 0x2bb   : > { %v831_v33 = vpop.xlane.xlu0 %830 }
 0x2bc   : > { %v836_v34 = vmul.f32 0.03125, %v831_v33 }
 0x2be   : > { %v838_v35 = vsub.f32 %v825_v29, %v836_v34 }
 0x2bf   : > { %v834_v36 = vpop.xlane.xlu0 %833 }
 0x2c0   : > { %v837_v37 = vmul.f32 0.03125, %v834_v36  ;;  %v840_v38 = vmul.f32 %v838_v35, %v838_v35 }
 0x2c2   : > { %v839_v39 = vsub.f32 %v826_v31, %v837_v37  ;;  %v842_v40 = vsel %vm573_vm1, %v840_v38, 0.0 }
 0x2c3   : > { %843 = vadd.xlane.f32.xlu1 %v842_v40 }
 0x2c4   : > { %v841_v41 = vmul.f32 %v839_v39, %v839_v39 }
 0x2c6   : > { %v845_v42 = vsel %vm573_vm1, %v841_v41, 0.0 }
 0x2c7   : > { %846 = vadd.xlane.f32.xlu1 %v845_v42 }
 0x350   : > { %v844_v58 = vpop.xlane.xlu1 %843 }
 0x351   : > { %v848_v59 = vmul.f32 0.03125, %v844_v58 }
 0x353   : > { %v850_v60 = vadd.f32 1e-05, %v848_v59 }
 0x354   : > { %v847_v61 = vpop.xlane.xlu1 %846 }
 0x355   : > { %1480 = vrsqrt.f32 %v850_v60  ;;  %v849_v62 = vmul.f32 0.03125, %v847_v61 }
 0x357   : > { %v851_v63 = vadd.f32 1e-05, %v849_v62 }
 0x359   : > { %1482 = vrsqrt.f32 %v851_v63 }
 0x35f   : > { %v1481_v0 = vpop.eup %1480 }
 0x360   : > { %v854_v2 = vmul.f32 %v1481_v0, %v838_v35 }
 0x362   : > { %v862_v4 = vmul.f32 %v1239_v1, %v854_v2 }
 0x363   : > { %v1483_v5 = vpop.eup %1482 }
 0x364   : > { %v855_v6 = vmul.f32 %v1483_v5, %v839_v39  ;;  %v870_v7 = vadd.f32 %v1240_v3, %v862_v4 }
 0x366   : > { %v863_v8 = vmul.f32 %v1239_v1, %v855_v6  ;;  %1336 = vmatprep.mubr.msk.f32.mxu1 %vm573_vm1, %v870_v7 }
 0x368   : > { %v871_v9 = vadd.f32 %v1240_v3, %v863_v8 }
 0x36a   : > { %1337 = vmatmul.mubr.msk.f32.vlgmr.msra.gmra.mrb[4].mxu1 %vm573_vm1, %v871_v9 }
 0x43d   : > { %v1338_v14 = vpop.f32.mrb[4].mxu1 }
 0x43e   : > { %v961_v15 = vadd.f32 %v1338_v14, %v1241_v13  ;;  %v955_v16 = vpop.f32.mrb[5].mxu1 }
 0x43f   : > { %v956_v17 = vadd.f32 %v1241_v13, %v955_v16 }
 0x440   : > { %v965_v19 = vmax.f32 %v961_v15, 0.0 }
 0x441   : > { %v964_v18 = vmax.f32 %v956_v17, 0.0 }
 0x443   : > { %1355 = vmatprep.mubr.msk.f32.mxu0 %vm981_vm2, %v964_v18 }
 0x444   : > { %1356 = vmatmul.mubr.msk.f32.vlgmr.msra.gmra.mrb[4].mxu0 %vm981_vm2, %v965_v19 }
 0x517   : > { %v1357_v21 = vpop.f32.mrb[4].mxu0 }
 0x518   : > { %v1060_v22 = vadd.f32 %v1357_v21, %v1244_v20  ;;  %v1054_v23 = vpop.f32.mrb[5].mxu0 }
 0x519   : > { %v1055_v24 = vadd.f32 %v1244_v20, %v1054_v23 }
 0x51a   : > { %v1064_v25 = vadd.f32 %v1060_v22, %v871_v9 }
 0x51b   : > { %v1063_v26 = vadd.f32 %v1055_v24, %v870_v7 }
 0x51c   : > { %v1070_v27 = vsel %vm573_vm1, %v1064_v25, 0.0 }
 0x51d   : > { %1071 = vadd.xlane.f32.xlu1 %v1070_v27  ;;  %v1067_v28 = vsel %vm573_vm1, %v1063_v26, 0.0 }
 0x51e   : > { %1068 = vadd.xlane.f32.xlu0 %v1067_v28 }
 0x5aa   : > { %v1072_v29 = vpop.xlane.xlu1 %1071 }
 0x5ab   : > { %v1074_v30 = vmul.f32 0.03125, %v1072_v29  ;;  %v1069_v31 = vpop.xlane.xlu0 %1068 }
 0x5ac   : > { %v1073_v32 = vmul.f32 0.03125, %v1069_v31 }
 0x5ad   : > { %v1076_v33 = vsub.f32 %v1064_v25, %v1074_v30 }
 0x5ae   : > { %v1075_v34 = vsub.f32 %v1063_v26, %v1073_v32 }
 0x5af   : > { %v1078_v35 = vmul.f32 %v1076_v33, %v1076_v33 }
 0x5b0   : > { %v1077_v36 = vmul.f32 %v1075_v34, %v1075_v34 }
 0x5b1   : > { %v1082_v37 = vsel %vm573_vm1, %v1078_v35, 0.0 }
 0x5b2   : > { %1083 = vadd.xlane.f32.xlu1 %v1082_v37  ;;  %v1079_v38 = vsel %vm573_vm1, %v1077_v36, 0.0 }
 0x5b3   : > { %1080 = vadd.xlane.f32.xlu0 %v1079_v38 }
 0x63f   : > { %v1084_v39 = vpop.xlane.xlu1 %1083 }
 0x640   : > { %v1086_v40 = vmul.f32 0.03125, %v1084_v39  ;;  %v1081_v41 = vpop.xlane.xlu0 %1080 }
 0x641   : > { %v1085_v42 = vmul.f32 0.03125, %v1081_v41 }
 0x642   : > { %v1088_v43 = vadd.f32 1e-05, %v1086_v40 }
 0x643   : > { %v1087_v44 = vadd.f32 1e-05, %v1085_v42 }
 0x644   : > { %1484 = vrsqrt.f32 %v1088_v43 }
 0x645   : > { %1486 = vrsqrt.f32 %v1087_v44 }
 0x64e   : > { %v1485_v45 = vpop.eup %1484 }
 0x64f   : > { %v1487_v47 = vpop.eup %1486  ;;  %v1092_v48 = vmul.f32 %v1485_v45, %v1076_v33 }
 0x650   : > { %v1091_v50 = vmul.f32 %v1487_v47, %v1075_v34 }
 0x651   : > { %v1100_v51 = vmul.f32 %v1247_v46, %v1092_v48 }
 0x652   : > { %v1099_v52 = vmul.f32 %v1247_v46, %v1091_v50 }
 0x653   : > { %v1108_v53 = vadd.f32 %v1248_v49, %v1100_v51 }
 0x654   : > { %v1107_v54 = vadd.f32 %v1248_v49, %v1099_v52 }
 0x655   : > { %1110 = vst.msk [vmem:[%s477_s20 + $0x8] sm:$0xff] %vm573_vm1, %v1108_v53 }
 0x656   : > { %1109 = vst.msk [vmem:[%s477_s20] sm:$0xff] %vm573_vm1, %v1107_v54 }
 0x657   : > { %1585 = shalt.err (!%p1582_p9)
}
 0x658   : > { %s1586_s24 = scalar_lea.hbm %s1973_s19, 256  ;;  %s1590_s25 = scalar_lea.hbm %s2068_s18, 512 }
 0x659   : > { %p1587_p2 = scmp.ne.s32.totalorder %s1973_s19, %s1586_s24  ;;  %p1591_p5 = scmp.lt.u32.totalorder %s1973_s19, %s2068_s18 }
 0x65a   : > { %p1592_p10 = scmp.lt.u32.totalorder %s1590_s25, %s1586_s24  ;;  %p1594_p12 = scmp.lt.u32.totalorder %s1586_s24, %s1973_s19 }
 0x65b   : > { %p1588_p0 = pnand %p1587_p2, %p2069_p7 }
 0x65c   : > { %p1593_p4 = por %p1592_p10, %p1591_p5 }
 0x65d   : > { %p1589_p3 = pneg %p1588_p0 }
 0x65e   : > { %p1595_p8 = por %p1594_p12, %p1593_p4 }
 0x660   : > { %p1596_p11 = pnand %p1595_p8, %p1589_p3 }
 0x662   : > { %1599 = shalt.err (!%p1596_p11)
}
 0x663   : > { %s1650_s14 = smov 128   ;;  %s1651_s13 = smov 8  }
 0x664   : > { %1418 = dma.vmem_to_hbm [thread:$0]  (%p2069_p7), %s1975_s17, 256, %s1973_s19, %s1979_s29, %s1650_s14, %s1650_s14, %s1651_s13  }
 0x665 PF: > { %s2070_s28 = sld [smem:[#allocation14_spill]]  ;;  %s2071_s21 = sld [smem:[#allocation12_spill]] }
 0x666   : > { %s2072_s15 = sld [smem:[#allocation18_spill]] }
 0x66b   : > { %p1440_p13 = scmp.ge.s32.totalorder %s2070_s28, 2  ;;  %s1140_s27 = sand.u32 1, %s2071_s21  }
 0x66c   : > { %p2073_p1 = scmp.ne.s32.totalorder %s2072_s15, 0  ;;  %s1141_s22 = scalar_lea.sflag [#allocation4], %s1140_s27 }
 0x66e   : > { %p1431_p6 = pnand %p1440_p13, %p2073_p1 }
 0x670   : > { %1625 = dma.done.wait (!%p1431_p6), %s1141_s22, 256  }
 0x671   : > { %1627 = vsyncadd (!%p1431_p6), %s1141_s22, 4294967040  ;;  %s2074_s28 = sld [smem:[#allocation15_spill]]  ;;  %s2075_s24 = sld [smem:[#allocation13_spill]] }
 0x672   : > { %s2076_s27 = sld [smem:[#allocation16_spill]]  ;;  %s2077_s25 = smov %s1634_s26 }
 0x677   : > { %p25_p9 = scmp.ge.s32.totalorder %s2074_s28, 4   ;;  %s2078_s26 = smov %s2075_s24 }
 0x679   :  { %27 = sbr.rel (!%p25_p9) target bundleno = 8 (0x8), region = 120 }
 0x680   :  { %1146 = vsyncpa [#allocation3], 1 }
 0x681   :  { %1148 = vsyncpa [#allocation3 + $0x1], 1 }
 0x682   :  { %1149 = vsyncpa [#allocation6], 1 }
 0x683   :  { %1150 = vsyncpa [#allocation4], 1 }
 0x684   :  { %1152 = vsyncpa [#allocation4 + $0x1], 1 }

</bundles_post_ra>
